<compile_context>
chip_gen: v5e
topology: v5e:2x2
jax: 0.10.0
libtpu: 0.0.40
codegen_flags: <defaults>
</compile_context>

<pallas_src>
import functools

import jax
import jax.numpy as jnp
from jax.experimental import pallas as pl
from jax.experimental.pallas import tpu as pltpu


def _round_up(x, m):
    return (x + m - 1) // m * m


def _patch_embed_kernel(p_ref, w_ref, b_ref, o_ref):
    # p_ref: (tm, K) bf16 im2col tile (K = C*kh*kw, full last dim -> contiguous DMA)
    # w_ref: (K, D)  bf16 weight, resident (constant index_map)
    # b_ref: (1, D)  f32 bias, resident
    # o_ref: (tm, D) output tile (f32 or bf16)
    acc = jnp.dot(p_ref[...], w_ref[...], preferred_element_type=jnp.float32)
    # Single K block -> per-tile bias add is correct.  If a K grid axis is ever
    # added, gate this with pl.when(k == pl.num_programs(-1) - 1).
    o_ref[...] = (acc + b_ref[...]).astype(o_ref.dtype)


@functools.partial(
    jax.jit, static_argnames=("kernel_size", "stride", "padding", "out_dtype"))
def patch_embed(x, weight, bias, *, kernel_size=7, stride=4, padding=3,
                out_dtype=jnp.float32):
    """x: (B, C, H, W) float32 (NCHW, like PyTorch).
    weight: (D, C, kh, kw), bias: (D,) — PyTorch Conv2d parameter layout.
    Returns (B, Ho, Wo, D) in `out_dtype` (NHWC, as in PatchEmbed.forward)."""
    B, C, H, W = x.shape
    D = weight.shape[0]
    kh = kw = kernel_size

    # im2col as one fused XLA op.  Its output-feature ordering is (c, kh, kw)
    # row-major, matching the PyTorch weight flattening below.
    patches = jax.lax.conv_general_dilated_patches(
        x.astype(jnp.bfloat16),
        filter_shape=(kh, kw),
        window_strides=(stride, stride),
        padding=((padding, padding), (padding, padding)),
        dimension_numbers=("NCHW", "OIHW", "NHWC"),
    )  # (B, Ho, Wo, K) bf16
    _, Ho, Wo, K = patches.shape
    M = B * Ho * Wo
    patches = patches.reshape(M, K)               # free reshape (merge leading dims)

    w2d = weight.reshape(D, K).T.astype(jnp.bfloat16)   # (K, D), no padding
    b2d = bias.reshape(1, D).astype(jnp.float32)        # (1, D)

    # Large M tile (amortize per-step overhead), multiple of 16 for bf16 sublane
    # packing.  K and D blocks span the full (true) dims: no pad, no slice.
    tm = min(2048, _round_up(M, 16))
    grid = (pl.cdiv(M, tm),)   # partial last block handled by Pallas masking

    out = pl.pallas_call(
        _patch_embed_kernel,
        out_shape=jax.ShapeDtypeStruct((M, D), out_dtype),
        grid_spec=pltpu.PrefetchScalarGridSpec(
            num_scalar_prefetch=0,
            grid=grid,
            in_specs=[
                pl.BlockSpec((tm, K), lambda i: (i, 0)),
                pl.BlockSpec((K, D), lambda i: (0, 0)),
                pl.BlockSpec((1, D), lambda i: (0, 0)),
            ],
            out_specs=pl.BlockSpec((tm, D), lambda i: (i, 0)),
        ),
        compiler_params=pltpu.CompilerParams(
            dimension_semantics=("parallel",),
            vmem_limit_bytes=32 * 1024 * 1024,  # tiles ~<14 MiB double-buffered
        ),
    )(patches, w2d, b2d)

    # Free metadata reshape to NHWC (no slice, no copy).
    return out.reshape(B, Ho, Wo, D)


if __name__ == "__main__":
    # Small, PatchEmbed-consistent shapes: B=2, in_chans=3, 16x16 image,
    # embed_dim=32, kernel=7, stride=4, pad=3 -> output (2, 4, 4, 32).
    B, C, H, W = 2, 3, 16, 16
    D, k = 32, 7

    key = jax.random.PRNGKey(0)
    kx, kw_, kb = jax.random.split(key, 3)
    x = jax.random.normal(kx, (B, C, H, W), dtype=jnp.float32)
    weight = jax.random.normal(kw_, (D, C, k, k), dtype=jnp.float32) * 0.02
    bias = jax.random.normal(kb, (D,), dtype=jnp.float32) * 0.02

    out = patch_embed(x, weight, bias, kernel_size=7, stride=4, padding=3)
    out = jax.block_until_ready(out)
    assert out.shape == (B, 4, 4, D), out.shape

    # Apples-to-apples reference: bf16 inputs, f32 accumulation, + bias.
    ref_bf16 = jax.lax.conv_general_dilated(
        x.astype(jnp.bfloat16), weight.astype(jnp.bfloat16),
        window_strides=(4, 4), padding=((3, 3), (3, 3)),
        dimension_numbers=("NCHW", "OIHW", "NCHW"),
        preferred_element_type=jnp.float32,
        precision=jax.lax.Precision.HIGHEST,
    ).transpose(0, 2, 3, 1) + bias.reshape(1, 1, 1, D)
    err_bf16 = float(jnp.max(jnp.abs(out - ref_bf16)))
    assert jnp.allclose(out, ref_bf16, atol=1e-2, rtol=1e-2), err_bf16

    # Loose sanity check vs the full-f32 conv (bounds bf16 input rounding only).
    ref_f32 = jax.lax.conv_general_dilated(
        x, weight, window_strides=(4, 4), padding=((3, 3), (3, 3)),
        dimension_numbers=("NCHW", "OIHW", "NCHW"),
        precision=jax.lax.Precision.HIGHEST,
    ).transpose(0, 2, 3, 1) + bias.reshape(1, 1, 1, D)
    err_f32 = float(jnp.max(jnp.abs(out - ref_f32)))
    assert err_f32 < 0.15, err_f32

    print("KERNEL_OK")
</pallas_src>

<mosaic_0001>
module attributes {stable_mosaic.version = 11 : i64} {
  func.func @_patch_embed_kernel(%arg0: i32, %arg1: memref<32x147xbf16, #tpu.memory_space<vmem>>, %arg2: memref<147x32xbf16, #tpu.memory_space<vmem>>, %arg3: memref<1x32xf32, #tpu.memory_space<vmem>>, %arg4: memref<32x32xf32, #tpu.memory_space<vmem>>) attributes {dimension_semantics = [#tpu.dimension_semantics<parallel>], iteration_bounds = array<i64: 1>, scalar_prefetch = 0 : i64, scratch_operands = 0 : i64, tpu.core_type = #tpu.core_type<tc>, window_params = [{transform_indices = @transform_0, window_bounds = array<i64: 32, 147>}, {pipeline_mode = #tpu.pipeline_mode<synchronous>, transform_indices = @transform_1, window_bounds = array<i64: 147, 32>}, {pipeline_mode = #tpu.pipeline_mode<synchronous>, transform_indices = @transform_2, window_bounds = array<i64: 1, 32>}, {transform_indices = @transform_3, window_bounds = array<i64: 32, 32>}]} {
    %c0 = arith.constant 0 : index
    %c0_0 = arith.constant 0 : index
    %0 = vector.load %arg1[%c0, %c0_0] : memref<32x147xbf16, #tpu.memory_space<vmem>>, vector<32x147xbf16>
    %c0_1 = arith.constant 0 : index
    %c0_2 = arith.constant 0 : index
    %1 = vector.load %arg2[%c0_1, %c0_2] : memref<147x32xbf16, #tpu.memory_space<vmem>>, vector<147x32xbf16>
    %cst = arith.constant dense<0.000000e+00> : vector<32x32xf32>
    %2 = tpu.matmul %0, %1, %cst {dimension_numbers = #tpu.dot_dimension_numbers<[1], [0], [0], [1], [0, 0, 1, 1], [], []>} : vector<32x147xbf16>, vector<147x32xbf16>, vector<32x32xf32> -> vector<32x32xf32>
    %c0_3 = arith.constant 0 : index
    %c0_4 = arith.constant 0 : index
    %3 = vector.load %arg3[%c0_3, %c0_4] : memref<1x32xf32, #tpu.memory_space<vmem>>, vector<1x32xf32>
    %4 = vector.broadcast %3 : vector<1x32xf32> to vector<32x32xf32>
    %5 = arith.addf %2, %4 : vector<32x32xf32>
    %c0_5 = arith.constant 0 : index
    %c0_6 = arith.constant 0 : index
    %6 = vector.load %arg4[%c0_5, %c0_6] : memref<32x32xf32, #tpu.memory_space<vmem>>, vector<32x32xf32>
    tpu.vector_store %arg4[%c0_5, %c0_6], %5 {strides = array<i32>} : memref<32x32xf32, #tpu.memory_space<vmem>>, vector<32x32xf32>,
    return
  }
  func.func @transform_0(%arg0: i32) -> (i32, i32) {
    %c0_i32 = arith.constant 0 : i32
    %c0_i32_0 = arith.constant 0 : i32
    return %arg0, %c0_i32 : i32, i32
  }
  func.func @transform_1(%arg0: i32) -> (i32, i32) {
    %c0_i32 = arith.constant 0 : i32
    %c0_i32_0 = arith.constant 0 : i32
    %c0_i32_1 = arith.constant 0 : i32
    return %c0_i32, %c0_i32_0 : i32, i32
  }
  func.func @transform_2(%arg0: i32) -> (i32, i32) {
    %c0_i32 = arith.constant 0 : i32
    %c0_i32_0 = arith.constant 0 : i32
    %c0_i32_1 = arith.constant 0 : i32
    return %c0_i32, %c0_i32_0 : i32, i32
  }
  func.func @transform_3(%arg0: i32) -> (i32, i32) {
    %c0_i32 = arith.constant 0 : i32
    %c0_i32_0 = arith.constant 0 : i32
    return %arg0, %c0_i32 : i32, i32
  }
}

</mosaic_0001>

<bundles_post_ra>
// kernel: patch_embed.1
= control target key start
LH: loop header
LB: loop body
LE: loop exit
PB: predicated region body
PF: predicated region fallthrough
CT: control target
= control target key end

     0   :  { %vm125_vm0 = vcmask 1040384   ;;  %vm126_vm1 = vcmask 1041408   ;;  %v299_v2 = vmov 65535   ;;  %s389_s0 = inlined_call_operand.vmem [shape: bf16[32,147], index: 0, kind: input, shape index: {}]   ;;  %s390_s1 = inlined_call_operand.vmem [shape: bf16[147,32], index: 1, kind: input, shape index: {}]   ;;  %s391_s2 = inlined_call_operand.vmem [shape: f32[1,32], index: 2, kind: input, shape index: {}]   ;;  %s392_s3 = inlined_call_operand.hbm [shape: f32[32,32], index: 3, kind: output, shape index: {}]  }
   0x1   :  { %v258_v0 = vld [vmem:[%s390_s1 + $0x38] sm:$0xff]  ;;  %v38_v1 = vld [vmem:[%s390_s1 + $0x48] sm:$0x3]  ;;  %v127_v3 = vsel %vm125_vm0, 4294967295, %v299_v2  ;;  %v257_v4 = vld [vmem:[%s390_s1 + $0x30] sm:$0xff] }
   0x2   :  { %132 = vmatpush.bf16.msra.mxu0 %v258_v0  ;;  %260 = vmatpush.bf16.msra.mxu2 %v258_v0  ;;  %v98_v5 = vunpack.c.l.b16 %v38_v1  ;;  %v128_v6 = vsel %vm126_vm1, %v127_v3, 0  ;;  %v256_v8 = vld [vmem:[%s390_s1 + $0x28] sm:$0xff] }
   0x4   :  { %v108_v7 = vpack.c.b16 %v98_v5, %v98_v5 }
   0x6   :  { %133 = vmatpush.bf16.msra.mxu0 %v257_v4  ;;  %261 = vmatpush.bf16.msra.mxu2 %v257_v4  ;;  %v130_v9 = vand.u32 %v128_v6, %v108_v7 }
   0x7   :  { %8 = vsyncpa [#allocation3], 0  ;;  %v259_v10 = vld [vmem:[%s390_s1 + $0x40] sm:$0xff]  ;;  %v197_v12 = vld [vmem:[%s389_s0 + $0x8] sm:$0xf0]  ;;  %vm118_vm2 = vcmask 154624  }
   0x8   :  { %157 = vmatpush.bf16.msra.mxu1 %v130_v9  ;;  %v247_v11 = vld [vmem:[%s389_s0 + $0x4] sm:$0xf]  ;;  %v254_v15 = vld [vmem:[%s390_s1 + $0x18] sm:$0xff]  ;;  %v253_v16 = vld [vmem:[%s390_s1 + $0x10] sm:$0xff]  ;;  %vm170_vm3 = vcmask 261120   ;;  %s181_s24 = sshll.u32 %s392_s3, 4  ;;  %s182_s24 = int_to_ptr.hbm [resolvable:$true] %s181_s24 }
   0x9   :  { %v255_v13 = vld [vmem:[%s390_s1 + $0x20] sm:$0xff]  ;;  %v200_v14 = vor.u32 %v247_v11, %v197_v12  ;;  %v252_v17 = vld [vmem:[%s390_s1 + $0x8] sm:$0xff]  ;;  %v249_v18 = vld [vmem:[%s389_s0 + $0x14] sm:$0xf]  ;;  %s301_s25 = smov 128   ;;  %s302_s26 = smov 8  }
   0xa   :  { %134 = vmatpush.bf16.msra.mxu0 %v256_v8  ;;  %262 = vmatpush.bf16.msra.mxu2 %v256_v8  ;;  %v205_v19 = vld [vmem:[%s389_s0 + $0x18] sm:$0xf0]  ;;  %v251_v20 = vld [vmem:[%s390_s1] sm:$0xff]  ;;  %v248_v22 = vld [vmem:[%s389_s0 + $0x4] sm:$0xf0] }
   0xb   :  { %v195_v21 = vld [vmem:[%s389_s0] sm:$0xf]  ;;  %v203_v23 = vld [vmem:[%s389_s0 + $0x10] sm:$0xf]  ;;  %v250_v24 = vld [vmem:[%s389_s0 + $0x14] sm:$0xf0]  ;;  %v208_v25 = vor.u32 %v249_v18, %v205_v19 }
   0xc   :  { %158 = vmatpush.bf16.msra.mxu1 %v259_v10  ;;  %v196_v26 = vor.u32 %v248_v22, %v195_v21  ;;  %v204_v27 = vor.u32 %v250_v24, %v203_v23  ;;  %v272_v30 = vld [vmem:[%s391_s2] ss:$0 sm:$0xff]  ;;  %s300_s0 = smov [#allocation2]  }
   0xd   :  { %s179_s22 = sshll.u32 %s300_s0, 4  ;;  %s180_s22 = int_to_ptr.vmem [resolvable:$true] %s179_s22 }
   0xe   :  { %135 = vmatpush.bf16.msra.mxu0 %v255_v13  ;;  %263 = vmatpush.bf16.msra.mxu2 %v255_v13 }
   0xf   :  { %245 = vmatmul.msk.bf16.vlgmr.msra.gmra.mxu1 %vm118_vm2, %v200_v14 }
  0x12   :  { %136 = vmatpush.bf16.msra.mxu0 %v254_v15  ;;  %264 = vmatpush.bf16.msra.mxu2 %v254_v15 }
  0x16   :  { %137 = vmatpush.bf16.msra.mxu0 %v253_v16  ;;  %265 = vmatpush.bf16.msra.mxu2 %v253_v16 }
  0x1a   :  { %138 = vmatpush.bf16.msra.mxu0 %v252_v17  ;;  %266 = vmatpush.bf16.msra.mxu2 %v252_v17 }
  0x1e   :  { %139 = vmatpush.bf16.msra.mxu0 %v251_v20  ;;  %267 = vmatpush.bf16.msra.mxu2 %v251_v20 }
  0x1f   :  { %246 = vmatmul.msk.bf16.gmra.mxu1 %vm118_vm2, %v208_v25 }
  0x21   :  { %140 = vmatmul.bf16.vlgmr.msra.gmra.mxu0 %v196_v26  ;;  %145 = vmatmul.bf16.vlgmr.msra.gmra.mxu2 %v204_v27 }
  0x8c   :  { %v160_v28 = vpop.f32.mrf.mxu1 }
  0x94   :  { %v162_v29 = vpop.f32.mrf.mxu1 }
  0x9c   :  { %v165_v34 = vpop.f32.mrf.mxu1 }
  0x9e   :  { %v141_v31 = vpop.f32.mrf.mxu0 }
  0x9f   :  { %v142_v32 = vadd.f32 %v272_v30, %v141_v31 }
  0xa1   :  { %v161_v33 = vadd.f32 %v160_v28, %v142_v32 }
  0xa3   :  { %171 = vst.msk [vmem:[#allocation2] sm:$0xff] %vm170_vm3, %v161_v33 }
  0xa4   :  { %v146_v35 = vpop.f32.mrf.mxu2  ;;  %v167_v43 = vpop.f32.mrf.mxu1 }
  0xa5   :  { %v147_v36 = vadd.f32 %v272_v30, %v146_v35 }
  0xa6   :  { %v143_v37 = vpop.f32.mrf.mxu0 }
  0xa7   :  { %v166_v38 = vadd.f32 %v165_v34, %v147_v36  ;;  %v144_v39 = vadd.f32 %v272_v30, %v143_v37 }
  0xa9   :  { %173 = vst.msk [vmem:[#allocation2 + $0x10] sm:$0xff] %vm170_vm3, %v166_v38  ;;  %v163_v40 = vadd.f32 %v162_v29, %v144_v39 }
  0xab   :  { %172 = vst.msk [vmem:[#allocation2 + $0x8] sm:$0xff] %vm170_vm3, %v163_v40 }
  0xac   :  { %v148_v41 = vpop.f32.mrf.mxu2 }
  0xad   :  { %v149_v42 = vadd.f32 %v272_v30, %v148_v41 }
  0xaf   :  { %v168_v44 = vadd.f32 %v167_v43, %v149_v42 }
  0xb1   :  { %174 = vst.msk [vmem:[#allocation2 + $0x18] sm:$0xff] %vm170_vm3, %v168_v44 }
  0xb2   :  { %187 = dma.vmem_to_hbm [thread:$0]  %s180_s22, 512, %s182_s24, [#allocation3], %s301_s25, %s301_s25, %s302_s26  }
  0xb3   :  { %297 = dma.done.wait [#allocation3], 512  }
  0xb4   :  { %298 = vsyncadd [#allocation3], 4294966784 }
  0xb5   :  { %192 = vsyncpa [#allocation3], 1 }

</bundles_post_ra>
